<compile_context>
chip_gen: v7x
topology: tpu7x:2x2x1
jax: 0.10.0
libtpu: 0.0.40
codegen_flags: <defaults>
</compile_context>

<pallas_src>
import jax
import jax.numpy as jnp
from jax.experimental import pallas as pl
from jax.experimental.pallas import tpu as pltpu


def _linear_kernel(x_ref, w_ref, o_ref):
    # x_ref: (slab_tm, pack*d_inp), w_ref: (pack*d_inp, pack*d_model) block-diag,
    # o_ref: (slab_tm, pack*d_model) — lane-dense (128-wide) store.
    o_ref[...] = jnp.dot(
        x_ref[...], w_ref[...], preferred_element_type=jnp.float32
    ).astype(o_ref.dtype)


def _round_up(a, b):
    return ((a + b - 1) // b) * b


def _choose_pack(d_model):
    """Smallest row-pack factor that makes the output block 128-lane dense."""
    for p in (1, 2, 4, 8, 16):
        if (p * d_model) % 128 == 0:
            return p
    return 1  # lane-sparse (masked) stores fallback; still correct


def prepack_weight(weight_t):
    """Hoisted, once-per-parameter block-diagonal expansion of the weight.

    (d_inp, d_model) -> (pack*d_inp, pack*d_model): one matmul then emits
    `pack` output rows per slab row, giving 128-lane-dense output stores.
    """
    d_inp, d_model = weight_t.shape
    pack = _choose_pack(d_model)
    return jnp.kron(jnp.eye(pack, dtype=weight_t.dtype), weight_t)


def time_feature_embedding(
    x,
    weight_t,
    packed_weight=None,
    *,
    max_block_tokens=32768,
    target_grid_steps=8,
    min_pallas_tokens=1024,
    out_dtype=None,
):
    """Bias-free linear: (B, L, d_inp) @ (d_inp, d_model) -> (B, L, d_model).

    x:             (B, L, d_inp) float32
    weight_t:      (d_inp, d_model) float32  (transposed PyTorch nn.Linear weight)
    packed_weight: optional prepack_weight(weight_t) result (hoisted per-parameter)
    """
    B, L, d_inp = x.shape
    d_model = weight_t.shape[1]
    M = B * L
    out_dtype = x.dtype if out_dtype is None else out_dtype

    # Tiny-M: a standalone pallas_call is pure launch overhead; plain einsum wins.
    if M < min_pallas_tokens:
        return jnp.einsum(
            "bld,dm->blm", x, weight_t, precision=jax.lax.Precision.HIGHEST
        ).astype(out_dtype)

    pack = _choose_pack(d_model)
    if packed_weight is None:
        packed_weight = prepack_weight(weight_t)
    slab_k = pack * d_inp
    slab_n = pack * d_model
    assert packed_weight.shape == (slab_k, slab_n)

    x2d = x.reshape(M, d_inp)

    # Pad only to the pack factor (plus enough rows for one 8-sublane slab);
    # usually a no-op. No pad-to-tile: the ragged last grid step is masked by
    # Pallas (rows computed from the partial tile past M_pad are never written).
    M_pad = max(_round_up(M, pack), pack * 8)
    if M_pad != M:
        x2d = jnp.pad(x2d, ((0, M_pad - M), (0, 0)))

    # Row-major slab repack: (M_pad, d_inp) -> (M_pad/pack, pack*d_inp).
    # Bit-identical HBM layout (f32 (M,32) == f32 (M/4,128)).
    slab_m = M_pad // pack
    x_slab = x2d.reshape(slab_m, slab_k)

    # Token tile: ~target_grid_steps grid steps amortizes the ~0.35 us fixed
    # per-step overhead and gives v7x's two TensorCores multiple tiles each;
    # capped at max_block_tokens (~9 MiB double-buffered, safe on all gens).
    row_align = pack * 8  # keeps slab_tm a multiple of 8 sublanes
    tm_cap = max(row_align, (max_block_tokens // row_align) * row_align)
    tm = _round_up(pl.cdiv(M_pad, target_grid_steps), row_align)
    tm = max(row_align, min(tm, tm_cap))
    slab_tm = tm // pack

    grid = (pl.cdiv(slab_m, slab_tm),)

    out_slab = pl.pallas_call(
        _linear_kernel,
        out_shape=jax.ShapeDtypeStruct((slab_m, slab_n), out_dtype),
        grid=grid,
        in_specs=[
            pl.BlockSpec((slab_tm, slab_k), lambda i: (i, 0)),
            pl.BlockSpec((slab_k, slab_n), lambda i: (0, 0)),  # DMA'd once, stays VMEM-resident
        ],
        out_specs=pl.BlockSpec((slab_tm, slab_n), lambda i: (i, 0)),
        compiler_params=pltpu.CompilerParams(
            dimension_semantics=("parallel",),  # v7x: shard token tiles across both TCs
        ),
    )(x_slab, packed_weight)

    out2d = out_slab.reshape(M_pad, d_model)
    if M_pad != M:
        out2d = out2d[:M]  # only when the (tiny) pack-padding actually triggered
    return out2d.reshape(B, L, d_model)


if __name__ == "__main__":
    # Module config: embed_type='timeF', freq='h' -> d_inp = 4
    d_model = 32
    d_inp = 4

    key = jax.random.PRNGKey(0)
    kx, kw, kx2 = jax.random.split(key, 3)

    # Deterministic synthetic parameter, shaped like nn.Linear(d_inp, d_model).weight.T
    bound = 1.0 / (d_inp ** 0.5)
    weight_t = jax.random.uniform(
        kw, (d_inp, d_model), dtype=jnp.float32, minval=-bound, maxval=bound
    )
    w_bd = prepack_weight(weight_t)  # hoisted: built once per parameter

    fwd = jax.jit(
        time_feature_embedding,
        static_argnames=(
            "max_block_tokens",
            "target_grid_steps",
            "min_pallas_tokens",
            "out_dtype",
        ),
    )

    # 1) Small shape (B=2, L=8): force the Pallas path (min_pallas_tokens=0) so the
    #    kernel, the pack-padding and the single-tile grid are all exercised.
    B, L = 2, 8
    x = jax.random.normal(kx, (B, L, d_inp), dtype=jnp.float32)
    out = jax.block_until_ready(fwd(x, weight_t, w_bd, min_pallas_tokens=0))
    ref = jnp.einsum("bld,dm->blm", x, weight_t, precision=jax.lax.Precision.HIGHEST)
    assert out.shape == (B, L, d_model)
    assert jnp.allclose(out, ref, atol=1e-4, rtol=1e-4)

    # 2) Larger shape: multi-step grid (8 tiles) with a ragged last tile and the
    #    no-pad / no-slice fast path (M = 32800 is a multiple of pack=4, not of tm).
    B2, L2 = 4, 8200
    x2 = jax.random.normal(kx2, (B2, L2, d_inp), dtype=jnp.float32)
    out2 = jax.block_until_ready(fwd(x2, weight_t, w_bd))
    ref2 = jnp.einsum("bld,dm->blm", x2, weight_t, precision=jax.lax.Precision.HIGHEST)
    assert out2.shape == (B2, L2, d_model)
    assert jnp.allclose(out2, ref2, atol=1e-4, rtol=1e-4)

    print("KERNEL_OK")
</pallas_src>

<mosaic_0001>
module attributes {stable_mosaic.version = 11 : i64} {
  func.func @_linear_kernel(%arg0: i32, %arg1: memref<8x16xf32, #tpu.memory_space<vmem>>, %arg2: memref<16x128xf32, #tpu.memory_space<vmem>>, %arg3: memref<8x128xf32, #tpu.memory_space<vmem>>) attributes {dimension_semantics = [#tpu.dimension_semantics<parallel>], iteration_bounds = array<i64: 1>, scalar_prefetch = 0 : i64, scratch_operands = 0 : i64, tpu.core_type = #tpu.core_type<tc>, window_params = [{transform_indices = @transform_0, window_bounds = array<i64: 8, 16>}, {pipeline_mode = #tpu.pipeline_mode<synchronous>, transform_indices = @transform_1, window_bounds = array<i64: 16, 128>}, {transform_indices = @transform_2, window_bounds = array<i64: 8, 128>}]} {
    %c0 = arith.constant 0 : index
    %c0_0 = arith.constant 0 : index
    %0 = vector.load %arg1[%c0, %c0_0] : memref<8x16xf32, #tpu.memory_space<vmem>>, vector<8x16xf32>
    %c0_1 = arith.constant 0 : index
    %c0_2 = arith.constant 0 : index
    %1 = vector.load %arg2[%c0_1, %c0_2] : memref<16x128xf32, #tpu.memory_space<vmem>>, vector<16x128xf32>
    %cst = arith.constant dense<0.000000e+00> : vector<8x128xf32>
    %2 = tpu.matmul %0, %1, %cst {dimension_numbers = #tpu.dot_dimension_numbers<[1], [0], [0], [1], [0, 0, 1, 1], [], []>} : vector<8x16xf32>, vector<16x128xf32>, vector<8x128xf32> -> vector<8x128xf32>
    %c0_3 = arith.constant 0 : index
    %c0_4 = arith.constant 0 : index
    %3 = vector.load %arg3[%c0_3, %c0_4] : memref<8x128xf32, #tpu.memory_space<vmem>>, vector<8x128xf32>
    tpu.vector_store %arg3[%c0_3, %c0_4], %2 {strides = array<i32>} : memref<8x128xf32, #tpu.memory_space<vmem>>, vector<8x128xf32>,
    return
  }
  func.func @transform_0(%arg0: i32) -> (i32, i32) {
    %c0_i32 = arith.constant 0 : i32
    %c0_i32_0 = arith.constant 0 : i32
    return %arg0, %c0_i32 : i32, i32
  }
  func.func @transform_1(%arg0: i32) -> (i32, i32) {
    %c0_i32 = arith.constant 0 : i32
    %c0_i32_0 = arith.constant 0 : i32
    %c0_i32_1 = arith.constant 0 : i32
    return %c0_i32, %c0_i32_0 : i32, i32
  }
  func.func @transform_2(%arg0: i32) -> (i32, i32) {
    %c0_i32 = arith.constant 0 : i32
    %c0_i32_0 = arith.constant 0 : i32
    return %arg0, %c0_i32 : i32, i32
  }
}

</mosaic_0001>

<bundles_post_ra>
// kernel: time_feature_embedding.1
= control target key start
LH: loop header
LB: loop body
LE: loop exit
PB: predicated region body
PF: predicated region fallthrough
CT: control target
= control target key end

     0   :  { %v110_v0 = vmov 0.0|0.0   ;;  %vm111_vm0 = vmmov 0   ;;  %v112_v3 = vmov 0.0   ;;  %vm14_vm1 = vcmask 130048   ;;  %s140_s1 = inlined_call_operand.vmem [shape: f32[16,128], index: 1, kind: input, shape index: {}]   ;;  %s141_s0 = inlined_call_operand.vmem [shape: f32[8,16], index: 0, kind: input, shape index: {}]   ;;  %s142_s2 = inlined_call_operand.vmem [shape: f32[8,128], index: 2, kind: output, shape index: {}]  }
   0x1   :  { %104 = vmatprep.subr.bf16.mxu0 %v110_v0  ;;  %v12_v1 = vld [vmem:[%s140_s1] sm:$0xff]  ;;  %v13_v2 = vld [vmem:[%s140_s1 + $0x8] sm:$0xff]  ;;  %101 = vmatprep.mubr.msk.f32.mxu0 %vm111_vm0, %v112_v3 }
   0x2   :  { %v105_v4 = vpack.c.bf16 %v13_v2, %v12_v1  ;;  %v11_v5 = vld [vmem:[%s141_s0] sm:$0xff] }
   0x4   :  { %106 = vmatpush3.bf16.msra.mxu0 %v105_v4 }
   0x7   :  { %102 = vmatmul.mubr.msk.f32.vlgmr.msra.gmra.mrb[0].mxu0 %vm14_vm1, %v11_v5 }
  0xda   :  { %v84_v6 = vpop.f32.mrb[0].mxu0 }
  0xdb   :  { %88 = vst [vmem:[%s142_s2] sm:$0xff] %v84_v6  ;;  %v103_v7 = vpop.f32.mrb[1].mxu0 }

</bundles_post_ra>
